<compile_context>
chip_gen: v6e
topology: v6e:2x2x1
jax: 0.10.0
libtpu: 0.0.40
codegen_flags: <defaults>
</compile_context>

<pallas_src>
import functools

import numpy as np
import jax
import jax.numpy as jnp
from jax.experimental import pallas as pl
from jax.experimental.pallas import tpu as pltpu


_MIN_BLOCK_ROWS = 8    # fill the 8-sublane dimension of each output tile
_MAX_BLOCK_ROWS = 64   # cap unroll / VMEM block size (64*384*4 B = 96 KiB/buf)


def _round_up(x, m):
    return ((x + m - 1) // m) * m


def _tutor_kernel(lhs_ref, g_ref, out_ref):
    # lhs_ref : SMEM (n_pad,) int32 LHS ids (scalar prefetch, pre-clamped)
    # g_ref   : VMEM (vocab, R)  whole grammar table, resident across the grid
    # out_ref : VMEM (BLOCK_ROWS, R) output block i
    i = pl.program_id(0)
    block_rows = out_ref.shape[0]
    base = i * block_rows
    for b in range(block_rows):                     # static, fully unrolled
        idx = lhs_ref[base + b]                     # scalar from SMEM
        out_ref[pl.ds(b, 1), :] = g_ref[pl.ds(idx, 1), :]


@jax.jit
def _grammar_tutor_lookup(lhs_flat, g):
    """Gathers g[lhs] as a lane-dense (n, R) int32 array, R = C*4*S."""
    vocab, max_count, four, max_seq = g.shape
    row_len = max_count * four * max_seq
    g2d = jnp.reshape(g, (vocab, row_len))          # wrapper-side layout plumbing

    n = lhs_flat.shape[0]                           # static under jit
    block_rows = min(_MAX_BLOCK_ROWS,
                     max(_MIN_BLOCK_ROWS, _round_up(n, _MIN_BLOCK_ROWS)))
    n_pad = _round_up(n, block_rows)

    # Pad ids with 0 (a valid table row) and clamp once on device so the
    # in-kernel dynamic VMEM reads can never go out of bounds.
    lhs_pad = jnp.clip(jnp.pad(lhs_flat.astype(jnp.int32), (0, n_pad - n)),
                       0, vocab - 1)

    # VMEM-resident-table path; conservative bound that also fits v7x
    # (64 MiB physical VMEM / 32 MiB default scoped limit).
    table_bytes = vocab * row_len * 4
    assert table_bytes <= 16 * 1024 * 1024, (
        "grammar table too large for the VMEM-resident gather path")
    # TODO(synk): add a manual DMA-gather fallback (memory_space=pl.ANY +
    # pltpu.make_async_copy per row) for vocabularies whose table exceeds VMEM.

    out = pl.pallas_call(
        _tutor_kernel,
        out_shape=jax.ShapeDtypeStruct((n_pad, row_len), g.dtype),
        grid_spec=pltpu.PrefetchScalarGridSpec(
            num_scalar_prefetch=1,
            grid=(n_pad // block_rows,),
            in_specs=[
                # Whole table, constant block index -> fetched into VMEM once.
                pl.BlockSpec((vocab, row_len), lambda i, lhs: (0, 0)),
            ],
            out_specs=pl.BlockSpec((block_rows, row_len),
                                   lambda i, lhs: (i, 0)),
        ),
        compiler_params=pltpu.CompilerParams(
            # No cross-step state -> independent steps; shard across cores.
            dimension_semantics=("parallel",)),
    )(lhs_pad, g2d)

    return out[:n]  # drop padded rows before the device->host transfer


def grammar_tutor_forward(lhs, g):
    """Replicates GrammarTutor.forward. Returns numpy (dynamic clipped shape)."""
    size_pref = lhs.shape
    _, max_count, four, max_seq = g.shape
    # PyTorch `long` -> int32 (safe for vocab ids / 0-1 grammar entries).
    lhs_flat = jnp.reshape(lhs, (-1,)).astype(jnp.int32)
    n = int(lhs_flat.shape[0])

    if n == 0:
        motto = np.zeros((0, max_count, four, max_seq), dtype=np.int32)
    else:
        motto_2d = _grammar_tutor_lookup(lhs_flat, g)
        motto = np.asarray(jax.block_until_ready(motto_2d))
        motto = motto.reshape(n, max_count, four, max_seq)

    # TODO(synk): boolean clipping yields data-dependent shapes -> host numpy.
    mask = motto[:, :, -1, :]
    seq_keep = mask.sum(axis=(0, 1)) > 0   # mask.sum([0, 1]) > 0
    cnt_keep = mask.sum(axis=(0, 2)) > 0   # mask.sum([0, 2]) > 0
    clipped = motto[:, :, :, seq_keep]
    clipped = clipped[:, cnt_keep, :, :]
    return clipped.reshape(*size_pref, *clipped.shape[-3:])


if __name__ == "__main__":
    vocab_size = 12
    lhs_num = 4
    max_count = 6
    max_seq = 16
    lhs_indexing = [2, 5, 7, 9]

    key = jax.random.PRNGKey(0)
    k1, k2, k3, k4 = jax.random.split(key, 4)

    # Deterministic synthetic padded_rhs_options: (lhs_num, max_count, 4, max_seq)
    n_opts = np.asarray(jax.random.randint(k1, (lhs_num,), 1, max_count + 1))
    lengths = np.asarray(jax.random.randint(k2, (lhs_num, max_count), 1, max_seq - 3))
    sym = np.asarray(jax.random.randint(k3, (lhs_num, max_count, max_seq), 1, vocab_size))
    growth = np.asarray(jax.random.randint(k4, (lhs_num, max_count, 2, max_seq), 0, 2))

    pos = np.arange(max_seq)[None, None, :]
    valid_opt = np.arange(max_count)[None, :] < n_opts[:, None]
    mask = ((pos < lengths[:, :, None]) & valid_opt[:, :, None]).astype(np.int32)

    padded = np.zeros((lhs_num, max_count, 4, max_seq), dtype=np.int32)
    padded[:, :, 0, :] = sym * mask                 # symbols
    padded[:, :, 1, :] = growth[:, :, 0, :] * mask  # parental_growth
    padded[:, :, 2, :] = growth[:, :, 1, :] * mask  # fraternal_growth
    padded[:, :, 3, :] = mask                       # mask

    g_np = np.zeros((vocab_size, max_count, 4, max_seq), dtype=np.int32)
    for lhs_id, rhs in zip(lhs_indexing, padded):
        g_np[lhs_id] = rhs
    g = jnp.asarray(g_np)

    # lhs batch: (batch=2, seq=3); includes id 0, which is not a grammar LHS.
    lhs = jnp.asarray(np.array([[2, 5, 0], [9, 2, 7]], dtype=np.int32))

    out = grammar_tutor_forward(lhs, g)

    # Pure-numpy reference of the PyTorch forward.
    lhs_np = np.asarray(lhs)
    motto_ref = g_np[lhs_np]
    motto_rs = motto_ref.reshape(-1, *motto_ref.shape[-3:])
    msk = motto_rs[:, :, -1, :]
    v_clipped = motto_rs[:, :, :, msk.sum(axis=(0, 1)) > 0]
    ref = v_clipped[:, msk.sum(axis=(0, 2)) > 0, :, :]
    ref = ref.reshape(*lhs_np.shape, *ref.shape[-3:])

    assert out.shape == ref.shape, (out.shape, ref.shape)
    assert np.array_equal(out, ref)
    print("KERNEL_OK")
</pallas_src>

<mosaic_0001>
module attributes {stable_mosaic.version = 11 : i64} {
  func.func @_tutor_kernel(%arg0: i32, %arg1: memref<8xi32, #tpu.memory_space<smem>>, %arg2: memref<12x384xi32, #tpu.memory_space<vmem>>, %arg3: memref<8x384xi32, #tpu.memory_space<vmem>>) attributes {dimension_semantics = [#tpu.dimension_semantics<parallel>], iteration_bounds = array<i64: 1>, scalar_prefetch = 1 : i64, scratch_operands = 0 : i64, tpu.core_type = #tpu.core_type<tc>, window_params = [{pipeline_mode = #tpu.pipeline_mode<synchronous>, transform_indices = @transform_0, window_bounds = array<i64: 12, 384>}, {transform_indices = @transform_1, window_bounds = array<i64: 8, 384>}]} {
    %c8_i32 = arith.constant 8 : i32
    %0 = arith.muli %arg0, %c8_i32 : i32
    %c0_i32 = arith.constant 0 : i32
    %1 = arith.addi %0, %c0_i32 : i32
    %2 = arith.index_cast %1 : i32 to index
    %3 = memref.load %arg1[%2] : memref<8xi32, #tpu.memory_space<smem>>
    %4 = arith.index_cast %3 : i32 to index
    %c0 = arith.constant 0 : index
    %5 = vector.load %arg2[%4, %c0] : memref<12x384xi32, #tpu.memory_space<vmem>>, vector<1x384xi32>
    %c0_0 = arith.constant 0 : index
    %c0_1 = arith.constant 0 : index
    %6 = vector.load %arg3[%c0_0, %c0_1] : memref<8x384xi32, #tpu.memory_space<vmem>>, vector<1x384xi32>
    tpu.vector_store %arg3[%c0_0, %c0_1], %5 {strides = array<i32>} : memref<8x384xi32, #tpu.memory_space<vmem>>, vector<1x384xi32>,
    %c1_i32 = arith.constant 1 : i32
    %7 = arith.addi %0, %c1_i32 : i32
    %8 = arith.index_cast %7 : i32 to index
    %9 = memref.load %arg1[%8] : memref<8xi32, #tpu.memory_space<smem>>
    %10 = arith.index_cast %9 : i32 to index
    %c0_2 = arith.constant 0 : index
    %11 = vector.load %arg2[%10, %c0_2] : memref<12x384xi32, #tpu.memory_space<vmem>>, vector<1x384xi32>
    %c1 = arith.constant 1 : index
    %c0_3 = arith.constant 0 : index
    %12 = vector.load %arg3[%c1, %c0_3] : memref<8x384xi32, #tpu.memory_space<vmem>>, vector<1x384xi32>
    tpu.vector_store %arg3[%c1, %c0_3], %11 {strides = array<i32>} : memref<8x384xi32, #tpu.memory_space<vmem>>, vector<1x384xi32>,
    %c2_i32 = arith.constant 2 : i32
    %13 = arith.addi %0, %c2_i32 : i32
    %14 = arith.index_cast %13 : i32 to index
    %15 = memref.load %arg1[%14] : memref<8xi32, #tpu.memory_space<smem>>
    %16 = arith.index_cast %15 : i32 to index
    %c0_4 = arith.constant 0 : index
    %17 = vector.load %arg2[%16, %c0_4] : memref<12x384xi32, #tpu.memory_space<vmem>>, vector<1x384xi32>
    %c2 = arith.constant 2 : index
    %c0_5 = arith.constant 0 : index
    %18 = vector.load %arg3[%c2, %c0_5] : memref<8x384xi32, #tpu.memory_space<vmem>>, vector<1x384xi32>
    tpu.vector_store %arg3[%c2, %c0_5], %17 {strides = array<i32>} : memref<8x384xi32, #tpu.memory_space<vmem>>, vector<1x384xi32>,
    %c3_i32 = arith.constant 3 : i32
    %19 = arith.addi %0, %c3_i32 : i32
    %20 = arith.index_cast %19 : i32 to index
    %21 = memref.load %arg1[%20] : memref<8xi32, #tpu.memory_space<smem>>
    %22 = arith.index_cast %21 : i32 to index
    %c0_6 = arith.constant 0 : index
    %23 = vector.load %arg2[%22, %c0_6] : memref<12x384xi32, #tpu.memory_space<vmem>>, vector<1x384xi32>
    %c3 = arith.constant 3 : index
    %c0_7 = arith.constant 0 : index
    %24 = vector.load %arg3[%c3, %c0_7] : memref<8x384xi32, #tpu.memory_space<vmem>>, vector<1x384xi32>
    tpu.vector_store %arg3[%c3, %c0_7], %23 {strides = array<i32>} : memref<8x384xi32, #tpu.memory_space<vmem>>, vector<1x384xi32>,
    %c4_i32 = arith.constant 4 : i32
    %25 = arith.addi %0, %c4_i32 : i32
    %26 = arith.index_cast %25 : i32 to index
    %27 = memref.load %arg1[%26] : memref<8xi32, #tpu.memory_space<smem>>
    %28 = arith.index_cast %27 : i32 to index
    %c0_8 = arith.constant 0 : index
    %29 = vector.load %arg2[%28, %c0_8] : memref<12x384xi32, #tpu.memory_space<vmem>>, vector<1x384xi32>
    %c4 = arith.constant 4 : index
    %c0_9 = arith.constant 0 : index
    %30 = vector.load %arg3[%c4, %c0_9] : memref<8x384xi32, #tpu.memory_space<vmem>>, vector<1x384xi32>
    tpu.vector_store %arg3[%c4, %c0_9], %29 {strides = array<i32>} : memref<8x384xi32, #tpu.memory_space<vmem>>, vector<1x384xi32>,
    %c5_i32 = arith.constant 5 : i32
    %31 = arith.addi %0, %c5_i32 : i32
    %32 = arith.index_cast %31 : i32 to index
    %33 = memref.load %arg1[%32] : memref<8xi32, #tpu.memory_space<smem>>
    %34 = arith.index_cast %33 : i32 to index
    %c0_10 = arith.constant 0 : index
    %35 = vector.load %arg2[%34, %c0_10] : memref<12x384xi32, #tpu.memory_space<vmem>>, vector<1x384xi32>
    %c5 = arith.constant 5 : index
    %c0_11 = arith.constant 0 : index
    %36 = vector.load %arg3[%c5, %c0_11] : memref<8x384xi32, #tpu.memory_space<vmem>>, vector<1x384xi32>
    tpu.vector_store %arg3[%c5, %c0_11], %35 {strides = array<i32>} : memref<8x384xi32, #tpu.memory_space<vmem>>, vector<1x384xi32>,
    %c6_i32 = arith.constant 6 : i32
    %37 = arith.addi %0, %c6_i32 : i32
    %38 = arith.index_cast %37 : i32 to index
    %39 = memref.load %arg1[%38] : memref<8xi32, #tpu.memory_space<smem>>
    %40 = arith.index_cast %39 : i32 to index
    %c0_12 = arith.constant 0 : index
    %41 = vector.load %arg2[%40, %c0_12] : memref<12x384xi32, #tpu.memory_space<vmem>>, vector<1x384xi32>
    %c6 = arith.constant 6 : index
    %c0_13 = arith.constant 0 : index
    %42 = vector.load %arg3[%c6, %c0_13] : memref<8x384xi32, #tpu.memory_space<vmem>>, vector<1x384xi32>
    tpu.vector_store %arg3[%c6, %c0_13], %41 {strides = array<i32>} : memref<8x384xi32, #tpu.memory_space<vmem>>, vector<1x384xi32>,
    %c7_i32 = arith.constant 7 : i32
    %43 = arith.addi %0, %c7_i32 : i32
    %44 = arith.index_cast %43 : i32 to index
    %45 = memref.load %arg1[%44] : memref<8xi32, #tpu.memory_space<smem>>
    %46 = arith.index_cast %45 : i32 to index
    %c0_14 = arith.constant 0 : index
    %47 = vector.load %arg2[%46, %c0_14] : memref<12x384xi32, #tpu.memory_space<vmem>>, vector<1x384xi32>
    %c7 = arith.constant 7 : index
    %c0_15 = arith.constant 0 : index
    %48 = vector.load %arg3[%c7, %c0_15] : memref<8x384xi32, #tpu.memory_space<vmem>>, vector<1x384xi32>
    tpu.vector_store %arg3[%c7, %c0_15], %47 {strides = array<i32>} : memref<8x384xi32, #tpu.memory_space<vmem>>, vector<1x384xi32>,
    return
  }
  func.func @transform_0(%arg0: i32, %arg1: memref<8xi32, #tpu.memory_space<smem>>) -> (i32, i32) {
    %c0_i32 = arith.constant 0 : i32
    %c0_i32_0 = arith.constant 0 : i32
    %c0_i32_1 = arith.constant 0 : i32
    return %c0_i32, %c0_i32_0 : i32, i32
  }
  func.func @transform_1(%arg0: i32, %arg1: memref<8xi32, #tpu.memory_space<smem>>) -> (i32, i32) {
    %c0_i32 = arith.constant 0 : i32
    %c0_i32_0 = arith.constant 0 : i32
    return %arg0, %c0_i32 : i32, i32
  }
}

</mosaic_0001>

<bundles_post_ra>
// kernel: _grammar_tutor_lookup.1
= control target key start
LH: loop header
LB: loop body
LE: loop exit
PB: predicated region body
PF: predicated region fallthrough
CT: control target
= control target key end

     0   :  { %s301_s0 = inlined_call_operand.vmem [shape: s32[8], index: 0, kind: input, shape index: {}]   ;;  %s302_s1 = inlined_call_operand.vmem [shape: s32[12,384], index: 1, kind: input, shape index: {}]   ;;  %s303_s2 = inlined_call_operand.hbm [shape: s32[8,384], index: 2, kind: output, shape index: {}]  }
   0x1   :  { %s7_s11 = sshll.u32 %s301_s0, 4  ;;  %s8_s11 = int_to_ptr.vmem [resolvable:$true] %s7_s11 }
   0x2   :  { %s186_s12 = scalar_lea.vmem %s8_s11, 16  ;;  %p191_p1 = scmp.lt.s32.totalorder %s8_s11, %s8_s11 }
   0x3   :  { %p187_p0 = scmp.ne.s32.totalorder %s8_s11, %s186_s12  ;;  %p192_p2 = scmp.lt.s32.totalorder %s186_s12, %s186_s12 }
   0x5   :  { %p193_p3 = por %p192_p2, %p191_p1 }
   0x7   :  { %p194_p4 = pnand %p193_p3, %p187_p0 }
   0x9   :  { %197 = shalt.err (!%p194_p4)  }
   0xa   :  { %s222_s13 = smov [#allocation3]  }
   0xb   :  { %10 = dma.vmem_to_smem %s8_s11, 16, %s222_s13, [#allocation2] }
   0xc   :  { %218 = dma.done.wait [#allocation2], 16 }
   0xd   :  { %219 = vsyncadd [#allocation2], 4294967280 }
   0xe   :  { %12 = sfence }
   0xf   :  { %s17_s14 = sld [smem:[#allocation3]] }
  0x10   :  { %13 = vsyncpa [#allocation5], 0  ;;  %s170_s15 = sld [smem:[#allocation3 + $0x1]]  ;;  %v27_v0 = vlaneseq }
  0x11   :  { %s172_s16 = sld [smem:[#allocation3 + $0x2]] }
  0x12   :  { %s242_s17 = sld [smem:[#allocation3 + $0x3]]  ;;  %vm248_vm0 = vcmp.lt.s32.totalorder %v27_v0, 384 }
  0x13   :  { %s244_s0 = sld [smem:[#allocation3 + $0x4]] }
  0x14   :  { %s246_s18 = sld [smem:[#allocation3 + $0x5]] }
  0x15   :  { %s18_s19 = sshra.s32 %s17_s14, 3  ;;  %s21_s20 = sand.u32 7, %s17_s14 }
  0x16   :  { %s169_s21 = smul.u32 24, %s18_s19  ;;  %s35_s22 = sshra.s32 %s170_s15, 3 }
  0x17   :  { %s38_s23 = sand.u32 7, %s170_s15  ;;  %s171_s24 = smul.u32 24, %s35_s22 }
  0x18   :  { %s24_s25 = sadd.s32 %s169_s21, %s21_s20  ;;  %s49_s26 = sshra.s32 %s172_s16, 3 }
  0x19   :  { %s25_s29 = scalar_lea.vmem %s302_s1, %s24_s25  ;;  %s41_s30 = sadd.s32 %s171_s24, %s38_s23 }
  0x1a   :  { %v26_v2 = vld [vmem:[%s25_s29] ss:$8 sm:$0x7]  ;;  %s42_s5 = scalar_lea.vmem %s302_s1, %s41_s30  ;;  %s52_s6 = sand.u32 7, %s172_s16 }
  0x1b   :  { %31 = vst.msk [vmem:[#allocation4] ss:$8 sm:$0x7] %vm248_vm0, %v26_v2  ;;  %v43_v3 = vld [vmem:[%s42_s5] ss:$8 sm:$0x7] }
  0x1c   :  { %s173_s7 = smul.u32 24, %s49_s26  ;;  %s63_s8 = sshra.s32 %s242_s17, 3  ;;  %45 = vst.msk [vmem:[#allocation4 + $0x1] ss:$8 sm:$0x7] %vm248_vm0, %v43_v3 }
  0x1d   :  { %s66_s9 = sand.u32 7, %s242_s17  ;;  %s175_s10 = smul.u32 24, %s63_s8 }
  0x1e   :  { %s55_s11 = sadd.s32 %s173_s7, %s52_s6  ;;  %s77_s12 = sshra.s32 %s244_s0, 3 }
  0x1f   :  { %s56_s15 = scalar_lea.vmem %s302_s1, %s55_s11  ;;  %s69_s16 = sadd.s32 %s175_s10, %s66_s9 }
  0x20   :  { %v57_v4 = vld [vmem:[%s56_s15] ss:$8 sm:$0x7]  ;;  %s70_s21 = scalar_lea.vmem %s302_s1, %s69_s16  ;;  %s80_s22 = sand.u32 7, %s244_s0 }
  0x21   :  { %59 = vst.msk [vmem:[#allocation4 + $0x2] ss:$8 sm:$0x7] %vm248_vm0, %v57_v4  ;;  %v71_v5 = vld [vmem:[%s70_s21] ss:$8 sm:$0x7] }
  0x22   :  { %s177_s23 = smul.u32 24, %s77_s12  ;;  %s91_s17 = sshra.s32 %s246_s18, 3  ;;  %73 = vst.msk [vmem:[#allocation4 + $0x3] ss:$8 sm:$0x7] %vm248_vm0, %v71_v5 }
  0x23   :  { %s94_s24 = sand.u32 7, %s246_s18  ;;  %s179_s25 = smul.u32 24, %s91_s17 }
  0x24   :  { %s83_s26 = sadd.s32 %s177_s23, %s80_s22  ;;  %s180_s27 = sld [smem:[#allocation3 + $0x6]] }
  0x25   :  { %s84_s30 = scalar_lea.vmem %s302_s1, %s83_s26  ;;  %s97_s3 = sadd.s32 %s179_s25, %s94_s24 }
  0x26   :  { %v85_v6 = vld [vmem:[%s84_s30] ss:$8 sm:$0x7]  ;;  %s98_s5 = scalar_lea.vmem %s302_s1, %s97_s3  ;;  %s182_s6 = sld [smem:[#allocation3 + $0x7]] }
  0x27   :  { %87 = vst.msk [vmem:[#allocation4 + $0x4] ss:$8 sm:$0x7] %vm248_vm0, %v85_v6  ;;  %v99_v7 = vld [vmem:[%s98_s5] ss:$8 sm:$0x7] }
  0x28   :  { %101 = vst.msk [vmem:[#allocation4 + $0x5] ss:$8 sm:$0x7] %vm248_vm0, %v99_v7  ;;  %s223_s9 = smov [#allocation4]  }
  0x29   :  { %s137_s10 = sshll.u32 %s223_s9, 4  ;;  %s138_s10 = int_to_ptr.vmem [resolvable:$true] %s137_s10 }
  0x2a   :  { %s105_s18 = sshra.s32 %s180_s27, 3  ;;  %s108_s7 = sand.u32 7, %s180_s27 }
  0x2b   :  { %s181_s8 = smul.u32 24, %s105_s18  ;;  %s198_s17 = scalar_lea.vmem %s138_s10, 384 }
  0x2c   :  { %s119_s11 = sshra.s32 %s182_s6, 3  ;;  %s122_s12 = sand.u32 7, %s182_s6 }
  0x2d   :  { %s111_s13 = sadd.s32 %s181_s8, %s108_s7  ;;  %s183_s14 = smul.u32 24, %s119_s11 }
  0x2e   :  { %s112_s19 = scalar_lea.vmem %s302_s1, %s111_s13  ;;  %p199_p5 = scmp.ne.s32.totalorder %s138_s10, %s198_s17 }
  0x2f   :  { %v113_v8 = vld [vmem:[%s112_s19] ss:$8 sm:$0x7]  ;;  %s125_s20 = sadd.s32 %s183_s14, %s122_s12  ;;  %p203_p6 = scmp.lt.s32.totalorder %s138_s10, %s138_s10 }
  0x30   :  { %115 = vst.msk [vmem:[#allocation4 + $0x6] ss:$8 sm:$0x7] %vm248_vm0, %v113_v8  ;;  %s126_s23 = scalar_lea.vmem %s302_s1, %s125_s20  ;;  %p204_p7 = scmp.lt.s32.totalorder %s198_s17, %s198_s17 }
  0x31   :  { %v127_v9 = vld [vmem:[%s126_s23] ss:$8 sm:$0x7] }
  0x32   :  { %129 = vst.msk [vmem:[#allocation4 + $0x7] ss:$8 sm:$0x7] %vm248_vm0, %v127_v9  ;;  %p205_p8 = por %p204_p7, %p203_p6 }
  0x34   :  { %p206_p9 = pnand %p205_p8, %p199_p5 }
  0x36   :  { %209 = shalt.err (!%p206_p9)
}
  0x37   :  { %140 = dma.vmem_to_hbm [thread:$0]  %s138_s10, 384, %s303_s2, [#allocation5]  }
  0x38   :  { %220 = dma.done.wait [#allocation5], 384  }
  0x39   :  { %221 = vsyncadd [#allocation5], 4294966912 }
  0x3a   :  { %144 = vsyncpa [#allocation5], 1 }

</bundles_post_ra>
